<compile_context>
chip_gen: v6e
topology: v6e:2x2x1
jax: 0.10.0
libtpu: 0.0.40
codegen_flags: <defaults>
</compile_context>

<pallas_src>
import functools

import jax
import jax.numpy as jnp
from jax.experimental import pallas as pl
from jax.experimental.pallas import tpu as pltpu


def _round_up(x, m):
    return ((x + m - 1) // m) * m


def _embed_kernel(x_ref, w_ref, add_ref, out_ref):
    # x_ref:   (tN, K)  bf16 patch rows (row 0 of the token axis is an all-zero
    #                   dummy standing in for the class token).
    # w_ref:   (K, D)   bf16 flattened conv weight, VMEM-resident (constant idx).
    # add_ref: (tN, D)  pre-folded additive term:
    #                   row 0     = class_embedding + pos[0]
    #                   rows 1..N = pos[1:] + conv bias
    # out_ref: (tN, D)  model-dtype output tile.
    acc = jnp.dot(x_ref[...], w_ref[...], preferred_element_type=jnp.float32)
    out_ref[...] = (acc + add_ref[...].astype(jnp.float32)).astype(out_ref.dtype)


def _vmem_block_bytes(tN, K, D, x_item, w_item, add_item, out_item):
    """Rough double-buffered VMEM footprint of one grid step (padded layout)."""
    Kl = _round_up(K, 128)
    Dl = _round_up(D, 128)
    Ks = _round_up(K, 8)
    tNs = _round_up(tN, 8)
    return 2 * (tNs * Kl * x_item        # patch tile
                + Ks * Dl * w_item       # resident weight
                + tNs * Dl * add_item    # adds tile
                + tNs * Dl * out_item)   # output tile


@functools.partial(jax.jit, static_argnames=("image_size", "patch_size"))
def intern_vision_embeddings(pixel_values, params, *, image_size, patch_size):
    """JAX/Pallas equivalent of InternVisionEmbeddings.forward (NCHW input)."""
    w = params["patch_weight"]          # (D, 3, P, P)  -- PyTorch Conv2d layout
    bias = params["patch_bias"]         # (D,)
    cls = params["class_embedding"]     # (1, 1, D)
    pos = params["position_embedding"]  # (1, num_positions, D)

    target_dtype = w.dtype
    mm_dtype = jnp.bfloat16             # MXU operand dtype (f32 accumulation)

    B, C, Himg, Wimg = pixel_values.shape
    P = patch_size
    H, W = Himg // P, Wimg // P
    N = H * W
    Ntok = N + 1
    D = w.shape[0]
    K = C * P * P

    # --- glue: unfold NCHW pixels into patch rows (B, N, K), K = (C, ph, pw),
    # prepend a zero class row.  K stays unpadded: full-dim last block dims are
    # legal, so no padded activation copy is materialized in HBM.
    # TODO(synk): reading raw NCHW stripes per tile inside the kernel would
    # remove this extra HBM pass over the pixels entirely.
    x = pixel_values.astype(mm_dtype).reshape(B, C, H, P, W, P)
    x = x.transpose(0, 2, 4, 1, 3, 5).reshape(B, N, K)
    x = jnp.pad(x, ((0, 0), (1, 0), (0, 0)))                     # (B, Ntok, K)

    # Conv2d weight (D, C, P, P) -> matmul weight (K, D), bf16.
    w2 = w.reshape(D, K).T.astype(mm_dtype)                      # (K, D)

    # --- position embedding (bicubic resize when the patch grid differs) ---
    grid_sz = image_size // patch_size
    pos_cls = pos[0, :1, :].astype(jnp.float32)                  # (1, D)
    pos_patch = pos[0, 1:, :].astype(jnp.float32)                # (grid^2, D)
    if (H, W) != (grid_sz, grid_sz):
        # TODO(synk): jax.image.resize(bicubic) uses a=-0.5 (+antialias on
        # downsample) vs. F.interpolate(bicubic, align_corners=False) a=-0.75,
        # so a resized grid can differ from PyTorch beyond a few ULPs.
        pe = pos_patch.reshape(1, grid_sz, grid_sz, D)
        pe = jax.image.resize(pe, (1, H, W, D), method="bicubic")
        pos_patch = pe.reshape(N, D)

    # Fold class embedding, conv bias and position embedding into one additive
    # (Ntok, D) term -> single aligned add in the kernel epilogue.
    adds = jnp.concatenate(
        [cls.reshape(1, D).astype(jnp.float32) + pos_cls,
         pos_patch + bias.astype(jnp.float32)[None, :]],
        axis=0).astype(target_dtype)                             # (Ntok, D)

    # --- tiling: full D per step (weight stays VMEM-resident), tokens tiled.
    itemsize = jnp.dtype(target_dtype).itemsize
    mm_itemsize = jnp.dtype(mm_dtype).itemsize
    budget = 40 * 1024 * 1024            # v7x-safe (64 MiB physical VMEM)

    candidates = ([Ntok] if Ntok <= 512 else []) + \
        [t for t in (512, 256, 128, 64, 32, 16, 8) if t <= Ntok]
    tN = candidates[-1]
    for t in candidates:
        if _vmem_block_bytes(t, K, D, mm_itemsize, mm_itemsize,
                             itemsize, itemsize) <= budget:
            tN = t
            break
    # Keep >= 4 parallel grid steps so v7x's two TensorCores stay balanced.
    while B * pl.cdiv(Ntok, tN) < 4 and tN > 8:
        tN = max(8, ((tN // 2) + 7) // 8 * 8)
    nN = pl.cdiv(Ntok, tN)

    est = _vmem_block_bytes(tN, K, D, mm_itemsize, mm_itemsize,
                            itemsize, itemsize)
    vmem_limit = int(min(max(est + (4 << 20), 16 << 20), 48 << 20))

    cost = pl.CostEstimate(
        flops=2 * B * Ntok * K * D,
        transcendentals=0,
        bytes_accessed=(x.size * mm_itemsize + w2.size * mm_itemsize
                        + adds.size * itemsize + B * Ntok * D * itemsize),
    )

    out = pl.pallas_call(
        _embed_kernel,
        out_shape=jax.ShapeDtypeStruct((B, Ntok, D), target_dtype),
        grid=(B, nN),
        in_specs=[
            pl.BlockSpec((pl.Squeezed(), tN, K), lambda b, n: (b, n, 0)),
            pl.BlockSpec((K, D), lambda b, n: (0, 0)),   # resident weight
            pl.BlockSpec((tN, D), lambda b, n: (n, 0)),
        ],
        out_specs=pl.BlockSpec((pl.Squeezed(), tN, D), lambda b, n: (b, n, 0)),
        compiler_params=pltpu.CompilerParams(
            dimension_semantics=("parallel", "parallel"),
            vmem_limit_bytes=vmem_limit,
        ),
        cost_estimate=cost,
    )(x, w2, adds)
    return out


def _reference(pixel_values, params, *, image_size, patch_size):
    """Plain-JAX reference (same math, mirroring the kernel's bf16 operands)."""
    w = params["patch_weight"]
    bias = params["patch_bias"]
    cls = params["class_embedding"]
    pos = params["position_embedding"]
    B, C, Himg, Wimg = pixel_values.shape
    P = patch_size
    H, W = Himg // P, Wimg // P
    D = w.shape[0]
    x = pixel_values.reshape(B, C, H, P, W, P).transpose(0, 2, 4, 1, 3, 5)
    x = x.reshape(B, H * W, C * P * P)
    pe = jnp.einsum("bnk,kd->bnd",
                    x.astype(jnp.bfloat16),
                    w.reshape(D, -1).T.astype(jnp.bfloat16),
                    preferred_element_type=jnp.float32) + bias
    cls_tok = jnp.broadcast_to(cls, (B, 1, D)).astype(pe.dtype)
    emb = jnp.concatenate([cls_tok, pe], axis=1)
    return (emb + pos).astype(w.dtype)  # native resolution: pos resize is identity


if __name__ == "__main__":
    def run_case(batch, hidden_size, image_size, patch_size, atol=2e-3):
        num_positions = (image_size // patch_size) ** 2 + 1
        key = jax.random.PRNGKey(0)
        k1, k2, k3, k4, k5 = jax.random.split(key, 5)
        params = {
            "class_embedding": jax.random.normal(
                k1, (1, 1, hidden_size), jnp.float32),
            "patch_weight": jax.random.normal(
                k2, (hidden_size, 3, patch_size, patch_size),
                jnp.float32) * 0.05,
            "patch_bias": jax.random.normal(
                k3, (hidden_size,), jnp.float32) * 0.05,
            "position_embedding": jax.random.normal(
                k4, (1, num_positions, hidden_size), jnp.float32),
        }
        pixel_values = jax.random.normal(
            k5, (batch, 3, image_size, image_size), jnp.float32)

        out = intern_vision_embeddings(
            pixel_values, params, image_size=image_size, patch_size=patch_size)
        out = jax.block_until_ready(out)

        ref = _reference(pixel_values, params,
                         image_size=image_size, patch_size=patch_size)
        assert out.shape == (batch, num_positions, hidden_size), out.shape
        err = float(jnp.max(jnp.abs(out.astype(jnp.float32)
                                    - ref.astype(jnp.float32))))
        assert err <= atol, f"max abs err {err}"

    # Small config (B=2, D=32): exercises the ragged 17-token -> 3x8 tiling,
    # the Squeezed batch axis and the resident-weight path.
    run_case(batch=2, hidden_size=32, image_size=16, patch_size=4)
    # Larger config: 257 tokens and D=640 kept whole per step (resident
    # weight), multi-step parallel grid with a ragged last tile.
    run_case(batch=1, hidden_size=640, image_size=64, patch_size=4)
    print("KERNEL_OK")
</pallas_src>

<mosaic_0001>
module attributes {stable_mosaic.version = 11 : i64} {
  func.func @_embed_kernel(%arg0: i32, %arg1: i32, %arg2: memref<1x8x48xbf16, #tpu.memory_space<vmem>>, %arg3: memref<48x32xbf16, #tpu.memory_space<vmem>>, %arg4: memref<8x32xf32, #tpu.memory_space<vmem>>, %arg5: memref<1x8x32xf32, #tpu.memory_space<vmem>>) attributes {dimension_semantics = [#tpu.dimension_semantics<parallel>, #tpu.dimension_semantics<parallel>], iteration_bounds = array<i64: 2, 3>, scalar_prefetch = 0 : i64, scratch_operands = 0 : i64, tpu.core_type = #tpu.core_type<tc>, window_params = [{transform_indices = @transform_0, window_bounds = array<i64: 1, 8, 48>}, {pipeline_mode = #tpu.pipeline_mode<synchronous>, transform_indices = @transform_1, window_bounds = array<i64: 48, 32>}, {transform_indices = @transform_2, window_bounds = array<i64: 8, 32>}, {transform_indices = @transform_3, window_bounds = array<i64: 1, 8, 32>}]} {
    %c0 = arith.constant 0 : index
    %c0_0 = arith.constant 0 : index
    %c0_1 = arith.constant 0 : index
    %0 = vector.load %arg2[%c0, %c0_0, %c0_1] : memref<1x8x48xbf16, #tpu.memory_space<vmem>>, vector<1x8x48xbf16>
    %1 = vector.shape_cast %0 : vector<1x8x48xbf16> to vector<8x48xbf16>
    %c0_2 = arith.constant 0 : index
    %c0_3 = arith.constant 0 : index
    %2 = vector.load %arg3[%c0_2, %c0_3] : memref<48x32xbf16, #tpu.memory_space<vmem>>, vector<48x32xbf16>
    %cst = arith.constant dense<0.000000e+00> : vector<8x32xf32>
    %3 = tpu.matmul %1, %2, %cst {dimension_numbers = #tpu.dot_dimension_numbers<[1], [0], [0], [1], [0, 0, 1, 1], [], []>} : vector<8x48xbf16>, vector<48x32xbf16>, vector<8x32xf32> -> vector<8x32xf32>
    %c0_4 = arith.constant 0 : index
    %c0_5 = arith.constant 0 : index
    %4 = vector.load %arg4[%c0_4, %c0_5] : memref<8x32xf32, #tpu.memory_space<vmem>>, vector<8x32xf32>
    %5 = arith.addf %3, %4 : vector<8x32xf32>
    %c0_6 = arith.constant 0 : index
    %c0_7 = arith.constant 0 : index
    %c0_8 = arith.constant 0 : index
    %6 = vector.load %arg5[%c0_6, %c0_7, %c0_8] : memref<1x8x32xf32, #tpu.memory_space<vmem>>, vector<1x8x32xf32>
    %7 = vector.shape_cast %6 : vector<1x8x32xf32> to vector<8x32xf32>
    %8 = vector.shape_cast %5 : vector<8x32xf32> to vector<1x8x32xf32>
    tpu.vector_store %arg5[%c0_6, %c0_7, %c0_8], %8 {strides = array<i32>} : memref<1x8x32xf32, #tpu.memory_space<vmem>>, vector<1x8x32xf32>,
    return
  }
  func.func @transform_0(%arg0: i32, %arg1: i32) -> (i32, i32, i32) {
    %c0_i32 = arith.constant 0 : i32
    %c0_i32_0 = arith.constant 0 : i32
    return %arg0, %arg1, %c0_i32 : i32, i32, i32
  }
  func.func @transform_1(%arg0: i32, %arg1: i32) -> (i32, i32) {
    %c0_i32 = arith.constant 0 : i32
    %c0_i32_0 = arith.constant 0 : i32
    %c0_i32_1 = arith.constant 0 : i32
    return %c0_i32, %c0_i32_0 : i32, i32
  }
  func.func @transform_2(%arg0: i32, %arg1: i32) -> (i32, i32) {
    %c0_i32 = arith.constant 0 : i32
    %c0_i32_0 = arith.constant 0 : i32
    return %arg1, %c0_i32 : i32, i32
  }
  func.func @transform_3(%arg0: i32, %arg1: i32) -> (i32, i32, i32) {
    %c0_i32 = arith.constant 0 : i32
    %c0_i32_0 = arith.constant 0 : i32
    return %arg0, %arg1, %c0_i32 : i32, i32, i32
  }
}

</mosaic_0001>

<bundles_post_ra>
// kernel: intern_vision_embeddings.1
= control target key start
LH: loop header
LB: loop body
LE: loop exit
PB: predicated region body
PF: predicated region fallthrough
CT: control target
= control target key end

     0   :  { %s526_s12 = smov 0   ;;  %s528_s13 = smov 0   ;;  %s589_s0 = inlined_call_operand.vmem [shape: bf16[2,17,48], index: 0, kind: input, shape index: {}]   ;;  %s590_s1 = inlined_call_operand.vmem [shape: bf16[48,32], index: 1, kind: input, shape index: {}]   ;;  %s591_s2 = inlined_call_operand.vmem [shape: f32[17,32], index: 2, kind: input, shape index: {}]   ;;  %s592_s3 = inlined_call_operand.vmem [shape: f32[2,17,32], index: 3, kind: output, shape index: {}]  }
   0x1   :  { %s530_s14 = smov 0   ;;  %s532_s15 = smov 0  }
   0x2   :  { %s534_s16 = smov 0  }
   0x3 LB: > { %s22_s17 = sadd.s32 1, %s494_s14  ;;  %s25_s18 = sadd.s32 1, %s498_s15  ;;  %s502_s16 = sphi %s534_s16, %s13_s16   ;;  %s498_s15 = sphi %s532_s15, %s596_s15   ;;  %s494_s14 = sphi %s530_s14, %s595_s14   ;;  %s490_s13 = sphi %s528_s13, %s594_s13   ;;  %s486_s12 = sphi %s526_s12, %s593_s12  }
   0x4   : > { %p23_p0 = scmp.ge.s32.totalorder %s22_s17, 3  ;;  %p394_p1 = scmp.ge.s32.totalorder %s502_s16, 1 }
   0x5   : > { %p165_p2 = scmp.lt.s32.totalorder %s502_s16, 7 }
   0x6   : > { %s598_s17 = smov (%p23_p0, %s22_s17), 0  ;;  %s600_s18 = smov (!%p23_p0, %s25_s18), %s498_s15 }
   0x7   : > { %p166_p3 = pnand %p394_p1, %p165_p2  ;;  %p27_p4 = scmp.ge.s32.totalorder %s600_s18, 2 }
   0x8   : > { %p199_p5 = scmp.lt.s32.totalorder (!%p166_p3), %s490_s13, 1  ;;  %p201_p6 = scmp.lt.s32.totalorder (!%p166_p3), %s486_s12, 2 }
   0x9   : > { %s602_s18 = smov (%p27_p4, %s600_s18), 0  ;;  %169 = sbr.rel (%p166_p3) target bundleno = 226 (0xe2), region = 32 }
   0xe   : > { %v461_v0 = vld [vmem:[%s590_s1 + $0x10] sm:$0xff]   ;;  %v504_v1 = vmov 0.0   ;;  %v462_v2 = vld [vmem:[%s590_s1 + $0x8] sm:$0xff]   ;;  %vm505_vm0 = vmmov 0   ;;  %s604_s13 = smov (!%p199_p5, %s490_s13), 1  ;;  %s606_s12 = smov (!%p201_p6, %s486_s12), 2 }
   0xf   : > { %408 = vmatprep.subr.bf16.mxu0 %v504_v1  ;;  %414 = vmatprep.mubr.msk.bf16.mxu0 %vm505_vm0, %v504_v1  ;;  %v463_v3 = vld [vmem:[%s590_s1] sm:$0xff]   ;;  %s418_s25 = smul.u32 3, %s604_s13  ;;  %vm246_vm1 = vcmask 392192   ;;  %s396_s4 = sshll.u32 %s606_s12, 3  ;;  %vm290_vm2 = vcmask 261120  }
  0x10   : > { %409 = vmatpush3.bf16.msra.mxu0 %v461_v0  ;;  %s210_s7 = scalar_lea.vmem %s591_s2, %s396_s4 }
  0x11   : > { %410 = vmatprep.subr.bf16.mxu0 %v504_v1  ;;  %s204_s26 = sadd.s32 %s418_s25, %s606_s12  ;;  %v227_v5 = vld [vmem:[%s210_s7] sm:$0xff] }
  0x12   : > { %s395_s27 = sshll.u32 %s204_s26, 2  ;;  %s397_s8 = sshll.u32 %s204_s26, 3 }
  0x13   : > { %s206_s30 = scalar_lea.vmem %s589_s0, %s395_s27  ;;  %s218_s11 = scalar_lea.vmem %s592_s3, %s397_s8 }
  0x14   : > { %411 = vmatpush3.bf16.msra.mxu0 %v462_v2  ;;  %v220_v4 = vld [vmem:[%s206_s30] sm:$0xf] }
  0x15   : > { %412 = vmatprep.subr.bf16.mxu0 %v504_v1 }
  0x18   : > { %413 = vmatpush3.bf16.msra.mxu0 %v463_v3 }
  0x1b   : > { %415 = vmatmul.mubr.msk.bf16.vlgmr.msra.gmra.mxu0 %vm246_vm1, %v220_v4 }
  0xdb   : > { %v284_v6 = vpop.f32.mrf.mxu0 }
  0xdc   : > { %v285_v7 = vadd.f32 %v284_v6, %v227_v5 }
  0xdd   : > { %v416_v8 = vpop.f32.mrf.mxu0 }
  0xde   : > { %291 = vst.msk [vmem:[%s218_s11] sm:$0xff] %vm290_vm2, %v285_v7 }
  0xdf   : > { %v287_v9 = vpop.f32.mrf.mxu0 }
  0xe1   : > { %v417_v10 = vpop.f32.mrf.mxu0 }
  0xe2 PF: > { %s13_s16 = sadd.s32 1, %s502_s16   ;;  %s593_s12 = smov %s494_s14 }
  0xe3   : > { %p10_p7 = scmp.ge.s32.totalorder %s13_s16, 8   ;;  %s594_s13 = smov %s498_s15 }
  0xe4   : > { %s595_s14 = smov %s598_s17  ;;  %s596_s15 = smov %s602_s18 }
  0xe5   :  { %12 = sbr.rel (!%p10_p7) target bundleno = 3 (0x3), region = 65 }

</bundles_post_ra>
